<compile_context>
chip_gen: v7x
topology: tpu7x:2x2x1
jax: 0.10.0
libtpu: 0.0.40
codegen_flags: <defaults>
</compile_context>

<pallas_src>
import functools

import jax
import jax.numpy as jnp
from jax.experimental import pallas as pl
from jax.experimental.pallas import tpu as pltpu


def _round_up(x, m):
    return ((x + m - 1) // m) * m


def _pick_tile(dim, target, align):
    """Largest multiple of `align` that divides `dim` and is <= target."""
    t = min(target, dim)
    t = max((t // align) * align, align)
    while dim % t != 0:
        t -= align
    return t


def _tile_config():
    """(bk_target, bn_target, vmem_limit_bytes) derived from VMEM capacity."""
    vmem_cap = 64 * 1024 * 1024  # conservative default if query fails
    try:
        info = pltpu.get_tpu_info()
        vmem_cap = int(getattr(info, "vmem_capacity_bytes", vmem_cap))
    except Exception:  # pragma: no cover - defensive
        pass
    if vmem_cap >= 96 * 1024 * 1024:
        # 128 MiB-class VMEM (v5e/v6e/...): single TensorCore per chip, so the
        # full Np=1024 can be one block; bf16 W tiles are 16 MiB (48 MiB at
        # 3-deep buffering), comfortably under a 100 MiB scoped limit.
        return 8192, 1024, 100 * 1024 * 1024
    # 64 MiB-class VMEM (v7x): 2 TensorCores -> keep >= 2 blocks along the
    # "parallel" N axis (bn <= Np/2) so both cores get work; bf16 W tiles are
    # 8 MiB (24 MiB at 3-deep buffering) under a 48 MiB scoped limit.
    return 8192, 512, 48 * 1024 * 1024


# ---------------------------------------------------------------------------
# Layer 1: tiled linear(+bias+ReLU) with K-reduction grid, bf16 weights.
# ---------------------------------------------------------------------------
def _fc1_kernel(x_ref, w_ref, b_ref, o_ref, *, apply_relu):
    """One (bm, bn) output tile; grid axis 2 reduces over K.

    The output block index (i, j) is constant across k, so the output tile is
    resident in VMEM across the reduction and is used as the accumulator.
    The activation tile is cast to the weight dtype (bf16) so the MXU gets its
    native bf16 path; accumulation stays f32 via preferred_element_type.
    """
    k = pl.program_id(2)

    prod = jnp.dot(
        x_ref[...].astype(w_ref.dtype),
        w_ref[...],
        preferred_element_type=jnp.float32,
    )

    @pl.when(k == 0)
    def _():
        o_ref[...] = prod          # first partial: write, no zero-fill + RMW

    @pl.when(k > 0)
    def _():
        o_ref[...] += prod

    @pl.when(k == pl.num_programs(2) - 1)
    def _():
        out = o_ref[...] + b_ref[...]
        if apply_relu:
            out = jnp.maximum(out, 0.0)
        o_ref[...] = out


def _linear_reduce_call(x, w, b, *, apply_relu, w_buffers):
    Mp, Kp = x.shape
    Kw, Np = w.shape
    assert Kp == Kw and b.shape == (1, Np)
    assert Mp % 8 == 0 and Kp % 128 == 0 and Np % 128 == 0

    bk_target, bn_target, vmem_limit = _tile_config()
    bm = _pick_tile(Mp, 256, 8)        # covers the whole batch for B <= 256
    bn = _pick_tile(Np, bn_target, 128)
    bk = _pick_tile(Kp, bk_target, 128)
    grid = (Mp // bm, Np // bn, Kp // bk)

    w_idx = lambda i, j, k: (k, j)
    w_spec = pl.BlockSpec((bk, bn), w_idx)
    if w_buffers > 2:
        try:
            w_spec = pl.BlockSpec(
                (bk, bn), w_idx, pipeline_mode=pl.Buffered(w_buffers)
            )
        except Exception:  # older Pallas builds: keep default double-buffering
            w_spec = pl.BlockSpec((bk, bn), w_idx)

    n_i, n_j = grid[0], grid[1]
    cost = pl.CostEstimate(
        flops=2 * Mp * Kp * Np,
        transcendentals=0,
        # x is re-streamed once per N tile, w/b once per M tile.
        bytes_accessed=int(
            x.nbytes * n_j + (w.nbytes + b.nbytes) * n_i + Mp * Np * 4
        ),
    )

    kernel = functools.partial(_fc1_kernel, apply_relu=apply_relu)

    return pl.pallas_call(
        kernel,
        out_shape=jax.ShapeDtypeStruct((Mp, Np), jnp.float32),
        grid_spec=pltpu.PrefetchScalarGridSpec(
            num_scalar_prefetch=0,
            grid=grid,
            in_specs=[
                pl.BlockSpec((bm, bk), lambda i, j, k: (i, k)),   # x tile (f32)
                w_spec,                                           # w tile (bf16)
                pl.BlockSpec((1, bn), lambda i, j, k: (0, j)),    # bias tile
            ],
            out_specs=pl.BlockSpec((bm, bn), lambda i, j, k: (i, j)),
        ),
        compiler_params=pltpu.CompilerParams(
            dimension_semantics=("parallel", "parallel", "arbitrary"),
            vmem_limit_bytes=vmem_limit,
        ),
        cost_estimate=cost,
    )(x, w, b)


def pallas_linear_reduce(x, w, b, *, apply_relu):
    """y = relu?(x @ w + b) for pre-padded operands.

    x: (Mp, Kp) f32, w: (Kp, Np) bf16/f32, b: (1, Np) f32, with Mp % 8 == 0 and
    Kp, Np multiples of 128. Returns (Mp, Np) f32.

    Prefers a 3-deep weight pipeline (the layer is pure HBM streaming); falls
    back to the default 2-deep pipeline if the buffered variant is rejected.
    """
    try:
        return _linear_reduce_call(x, w, b, apply_relu=apply_relu, w_buffers=3)
    except Exception:
        return _linear_reduce_call(x, w, b, apply_relu=apply_relu, w_buffers=2)


# ---------------------------------------------------------------------------
# Layers 2-4 fused: relu(relu(x@W2+b2)@W3+b3)@W4+b4 in one kernel.
# ---------------------------------------------------------------------------
def _tail_kernel(x_ref, w2_ref, b2_ref, w3_ref, b3_ref, w4_ref, b4_ref, o_ref):
    h = jnp.dot(x_ref[...], w2_ref[...], preferred_element_type=jnp.float32)
    h = jnp.maximum(h + b2_ref[...], 0.0)
    h = jnp.dot(h, w3_ref[...], preferred_element_type=jnp.float32)
    h = jnp.maximum(h + b3_ref[...], 0.0)
    out = jnp.dot(h, w4_ref[...], preferred_element_type=jnp.float32)
    o_ref[...] = out + b4_ref[...]


def pallas_mlp_tail(h, tail_params):
    """Fused fc2->relu->fc3->relu->fc4 on pre-padded operands.

    h: (Mp, K2p) f32.  tail_params: 3 dicts with padded 'w' (Kp, Np) and
    'b' (1, Np).  All weights fit comfortably in VMEM, so they are loaded
    whole (no K/N tiling); only the batch axis is gridded.
    """
    assert len(tail_params) == 3
    Mp, K2p = h.shape
    (w2, b2), (w3, b3), (w4, b4) = [(p["w"], p["b"]) for p in tail_params]
    assert w2.shape[0] == K2p
    N4p = w4.shape[1]

    _, _, vmem_limit = _tile_config()
    bm = _pick_tile(Mp, 256, 8)
    grid = (Mp // bm,)

    flops = 2 * Mp * sum(p["w"].shape[0] * p["w"].shape[1] for p in tail_params)
    bytes_accessed = int(
        h.nbytes
        + sum(p["w"].nbytes + p["b"].nbytes for p in tail_params) * grid[0]
        + Mp * N4p * 4
    )
    cost = pl.CostEstimate(
        flops=flops, transcendentals=0, bytes_accessed=bytes_accessed
    )

    def _whole(arr):
        shape = arr.shape
        return pl.BlockSpec(shape, lambda i: (0,) * len(shape))

    return pl.pallas_call(
        _tail_kernel,
        out_shape=jax.ShapeDtypeStruct((Mp, N4p), jnp.float32),
        grid_spec=pltpu.PrefetchScalarGridSpec(
            num_scalar_prefetch=0,
            grid=grid,
            in_specs=[
                pl.BlockSpec((bm, K2p), lambda i: (i, 0)),  # activations
                _whole(w2), _whole(b2),
                _whole(w3), _whole(b3),
                _whole(w4), _whole(b4),
            ],
            out_specs=pl.BlockSpec((bm, N4p), lambda i: (i, 0)),
        ),
        compiler_params=pltpu.CompilerParams(
            dimension_semantics=("parallel",),
            vmem_limit_bytes=vmem_limit,
        ),
        cost_estimate=cost,
    )(h, w2, b2, w3, b3, w4, b4)


# ---------------------------------------------------------------------------
# Params + forward
# ---------------------------------------------------------------------------
def init_mlp_params(key, dims, *, fc1_dtype=jnp.bfloat16):
    """nn.Linear-style init, weights stored as (in, out) and padded ONCE to
    TPU-friendly shapes (K, N rounded up to 128). Zero padding is exact for
    matmul + bias + ReLU, and the padding chains exactly through the stack.

    fc1's weight (the only HBM-bound operand) is stored in bf16, halving its
    HBM stream; biases and the tiny fc2-fc4 weights stay f32.
    """
    params = []
    for idx, (fan_in, fan_out) in enumerate(zip(dims[:-1], dims[1:])):
        key, kw, kb = jax.random.split(key, 3)
        bound = 1.0 / jnp.sqrt(jnp.float32(fan_in))
        w = jax.random.uniform(
            kw, (fan_in, fan_out), jnp.float32, minval=-bound, maxval=bound
        )
        b = jax.random.uniform(
            kb, (fan_out,), jnp.float32, minval=-bound, maxval=bound
        )
        kp, np_ = _round_up(fan_in, 128), _round_up(fan_out, 128)
        w_dtype = fc1_dtype if idx == 0 else jnp.float32
        wp = (
            jnp.zeros((kp, np_), w_dtype)
            .at[:fan_in, :fan_out]
            .set(w.astype(w_dtype))
        )
        bp = jnp.zeros((1, np_), jnp.float32).at[0, :fan_out].set(b)
        params.append(dict(w=wp, b=bp, k=fan_in, n=fan_out, kp=kp, np=np_))
    return params


def mlp_forward(x, params):
    """Pallas forward: flatten, fc1 (tiled kernel, +ReLU), fused fc2-fc4."""
    assert len(params) == 4
    B = x.shape[0]
    h = x.reshape(B, -1).astype(jnp.float32)  # same as torch x.view(B, -1)

    l1 = params[0]
    Mp = _round_up(B, 8)
    hp = jnp.zeros((Mp, l1["kp"]), jnp.float32).at[:B, : l1["k"]].set(h)

    h1 = pallas_linear_reduce(hp, l1["w"], l1["b"], apply_relu=True)
    out_p = pallas_mlp_tail(h1, params[1:])
    return out_p[:B, : params[-1]["n"]]


def mlp_forward_ref(x, params):
    """Pure-JAX reference (same stored weights, f32 accumulation)."""
    B = x.shape[0]
    h = x.reshape(B, -1).astype(jnp.float32)
    n_layers = len(params)
    for idx, p in enumerate(params):
        w = p["w"][: p["k"], : p["n"]]
        b = p["b"][0, : p["n"]]
        h = jnp.dot(h.astype(w.dtype), w, preferred_element_type=jnp.float32) + b
        if idx < n_layers - 1:
            h = jnp.maximum(h, 0.0)
    return h


if __name__ == "__main__":
    key = jax.random.PRNGKey(0)

    # Small-shape demo consistent with the module's structure.
    # Full-size module dims would be (4096*64, 1024, 256, 64, 3).
    B, C, H, W = 2, 4, 16, 16                  # input flattens to 1024 features
    dims = (C * H * W, 256, 128, 64, 3)        # scaled-down fc1..fc4 stack

    key, kx = jax.random.split(key)
    x = jax.random.normal(kx, (B, C, H, W), jnp.float32)

    params = init_mlp_params(key, dims)

    out = mlp_forward(x, params)
    out = jax.block_until_ready(out)

    ref = mlp_forward_ref(x, params)
    assert out.shape == (B, dims[-1]), out.shape
    assert jnp.allclose(out, ref, atol=1e-3, rtol=1e-3), (
        float(jnp.max(jnp.abs(out - ref)))
    )

    print("KERNEL_OK")
</pallas_src>

<mosaic_0001>
module attributes {stable_mosaic.version = 11 : i64} {
  func.func @_fc1_kernel(%arg0: i32, %arg1: i32, %arg2: i32, %arg3: memref<8x1024xf32, #tpu.memory_space<vmem>>, %arg4: memref<1024x256xbf16, #tpu.memory_space<vmem>>, %arg5: memref<1x256xf32, #tpu.memory_space<vmem>>, %arg6: memref<8x256xf32, #tpu.memory_space<vmem>>) attributes {dimension_semantics = [#tpu.dimension_semantics<parallel>, #tpu.dimension_semantics<parallel>, #tpu.dimension_semantics<arbitrary>], iteration_bounds = array<i64: 1, 1, 1>, scalar_prefetch = 0 : i64, scratch_operands = 0 : i64, tpu.core_type = #tpu.core_type<tc>, window_params = [{transform_indices = @transform_0, window_bounds = array<i64: 8, 1024>}, {transform_indices = @transform_1, window_bounds = array<i64: 1024, 256>}, {transform_indices = @transform_2, window_bounds = array<i64: 1, 256>}, {transform_indices = @transform_3, window_bounds = array<i64: 8, 256>}]} {
    %c0 = arith.constant 0 : index
    %c0_0 = arith.constant 0 : index
    %0 = vector.load %arg3[%c0, %c0_0] : memref<8x1024xf32, #tpu.memory_space<vmem>>, vector<8x1024xf32>
    %1 = arith.truncf %0 : vector<8x1024xf32> to vector<8x1024xbf16>
    %c0_1 = arith.constant 0 : index
    %c0_2 = arith.constant 0 : index
    %2 = vector.load %arg4[%c0_1, %c0_2] : memref<1024x256xbf16, #tpu.memory_space<vmem>>, vector<1024x256xbf16>
    %cst = arith.constant dense<0.000000e+00> : vector<8x256xf32>
    %3 = tpu.matmul %1, %2, %cst {dimension_numbers = #tpu.dot_dimension_numbers<[1], [0], [0], [1], [0, 0, 1, 1], [], []>} : vector<8x1024xbf16>, vector<1024x256xbf16>, vector<8x256xf32> -> vector<8x256xf32>
    %c0_i32 = arith.constant 0 : i32
    %4 = arith.cmpi eq, %arg2, %c0_i32 : i32
    %5 = arith.extui %4 : i1 to i32
    %c0_i32_3 = arith.constant 0 : i32
    %6 = arith.cmpi ne, %5, %c0_i32_3 : i32
    scf.if %6 {
      %c0_8 = arith.constant 0 : index
      %c0_9 = arith.constant 0 : index
      %13 = vector.load %arg6[%c0_8, %c0_9] : memref<8x256xf32, #tpu.memory_space<vmem>>, vector<8x256xf32>
      tpu.vector_store %arg6[%c0_8, %c0_9], %3 {strides = array<i32>} : memref<8x256xf32, #tpu.memory_space<vmem>>, vector<8x256xf32>,
    } else {
    }
    %c0_i32_4 = arith.constant 0 : i32
    %7 = arith.cmpi sgt, %arg2, %c0_i32_4 : i32
    %8 = arith.extui %7 : i1 to i32
    %c0_i32_5 = arith.constant 0 : i32
    %9 = arith.cmpi ne, %8, %c0_i32_5 : i32
    scf.if %9 {
      %c0_8 = arith.constant 0 : index
      %c0_9 = arith.constant 0 : index
      %13 = vector.load %arg6[%c0_8, %c0_9] : memref<8x256xf32, #tpu.memory_space<vmem>>, vector<8x256xf32>
      %14 = arith.addf %13, %3 : vector<8x256xf32>
      %c0_10 = arith.constant 0 : index
      %c0_11 = arith.constant 0 : index
      %15 = vector.load %arg6[%c0_10, %c0_11] : memref<8x256xf32, #tpu.memory_space<vmem>>, vector<8x256xf32>
      tpu.vector_store %arg6[%c0_10, %c0_11], %14 {strides = array<i32>} : memref<8x256xf32, #tpu.memory_space<vmem>>, vector<8x256xf32>,
    } else {
    }
    %c0_i32_6 = arith.constant 0 : i32
    %10 = arith.cmpi eq, %arg2, %c0_i32_6 : i32
    %11 = arith.extui %10 : i1 to i32
    %c0_i32_7 = arith.constant 0 : i32
    %12 = arith.cmpi ne, %11, %c0_i32_7 : i32
    scf.if %12 {
      %c0_8 = arith.constant 0 : index
      %c0_9 = arith.constant 0 : index
      %13 = vector.load %arg6[%c0_8, %c0_9] : memref<8x256xf32, #tpu.memory_space<vmem>>, vector<8x256xf32>
      %c0_10 = arith.constant 0 : index
      %c0_11 = arith.constant 0 : index
      %14 = vector.load %arg5[%c0_10, %c0_11] : memref<1x256xf32, #tpu.memory_space<vmem>>, vector<1x256xf32>
      %15 = vector.broadcast %14 : vector<1x256xf32> to vector<8x256xf32>
      %16 = arith.addf %13, %15 : vector<8x256xf32>
      %cst_12 = arith.constant 0.000000e+00 : f32
      %17 = vector.broadcast %cst_12 : f32 to vector<8x256xf32>
      %18 = arith.maximumf %16, %17 : vector<8x256xf32>
      %c0_13 = arith.constant 0 : index
      %c0_14 = arith.constant 0 : index
      %19 = vector.load %arg6[%c0_13, %c0_14] : memref<8x256xf32, #tpu.memory_space<vmem>>, vector<8x256xf32>
      tpu.vector_store %arg6[%c0_13, %c0_14], %18 {strides = array<i32>} : memref<8x256xf32, #tpu.memory_space<vmem>>, vector<8x256xf32>,
    } else {
    }
    return
  }
  func.func @transform_0(%arg0: i32, %arg1: i32, %arg2: i32) -> (i32, i32) {
    %c0_i32 = arith.constant 0 : i32
    return %arg0, %arg2 : i32, i32
  }
  func.func @transform_1(%arg0: i32, %arg1: i32, %arg2: i32) -> (i32, i32) {
    %c0_i32 = arith.constant 0 : i32
    return %arg2, %arg1 : i32, i32
  }
  func.func @transform_2(%arg0: i32, %arg1: i32, %arg2: i32) -> (i32, i32) {
    %c0_i32 = arith.constant 0 : i32
    %c0_i32_0 = arith.constant 0 : i32
    return %c0_i32, %arg1 : i32, i32
  }
  func.func @transform_3(%arg0: i32, %arg1: i32, %arg2: i32) -> (i32, i32) {
    %c0_i32 = arith.constant 0 : i32
    return %arg0, %arg1 : i32, i32
  }
}

</mosaic_0001>

<bundles_post_ra>
// kernel: tpu_custom_call.1
= control target key start
LH: loop header
LB: loop body
LE: loop exit
PB: predicated region body
PF: predicated region fallthrough
CT: control target
= control target key end

     0   :  { %8 = vsyncpa [#allocation3], 0  ;;  %s1512_s0 = inlined_call_operand.hbm [shape: f32[8,1024], index: 0, kind: input, shape index: {}]   ;;  %s1513_s1 = inlined_call_operand.hbm [shape: bf16[1024,256], index: 1, kind: input, shape index: {}]   ;;  %s1514_s2 = inlined_call_operand.vmem [shape: f32[1,256], index: 2, kind: input, shape index: {}]   ;;  %s1515_s3 = inlined_call_operand.hbm [shape: f32[8,256], index: 3, kind: output, shape index: {}]  }
   0x1   :  { %9 = vsyncpa [#allocation6], 0 }
   0x2   :  { %10 = vsyncpa [#allocation4], 0  ;;  %s1441_s12 = smov [#allocation2]   ;;  %s1442_s14 = smov [#allocation5]  }
   0x3   :  { %s17_s13 = sshll.u32 %s1441_s12, 4  ;;  %s26_s15 = sshll.u32 %s1442_s14, 4  ;;  %s18_s13 = int_to_ptr.vmem [resolvable:$true] %s17_s13  ;;  %s1466_s15 = int_to_ptr.vmem [resolvable:$true] %s26_s15 }
   0x4   :  { %s1369_s18 = scalar_lea.hbm %s1512_s0, 1024 }
   0x5   :  { %p1370_p0 = scmp.ne.s32.totalorder %s1512_s0, %s1369_s18  ;;  %p1373_p1 = scmp.lt.u32.totalorder %s1369_s18, %s1512_s0 }
   0x7   :  { %p1375_p2 = pnand %p1373_p1, %p1370_p0 }
   0x9   :  { %1378 = shalt.err (!%p1375_p2)
}
   0xa   :  { %s1379_s23 = scalar_lea.vmem %s18_s13, 1024  ;;  %p1384_p4 = scmp.lt.s32.totalorder %s18_s13, %s18_s13 }
   0xb   :  { %p1380_p3 = scmp.ne.s32.totalorder %s18_s13, %s1379_s23  ;;  %p1385_p5 = scmp.lt.s32.totalorder %s1379_s23, %s1379_s23 }
   0xd   :  { %p1386_p6 = por %p1385_p5, %p1384_p4 }
   0xf   :  { %p1387_p7 = pnand %p1386_p6, %p1380_p3 }
  0x11   :  { %1390 = shalt.err (!%p1387_p7)
}
  0x12   :  { %20 = dma.hbm_to_vmem [thread:$0]  %s1512_s0, 1024, %s18_s13, [#allocation3]  }
  0x13   :  { %s1391_s28 = scalar_lea.hbm %s1513_s1, 16384 }
  0x14   :  { %p1392_p8 = scmp.ne.s32.totalorder %s1513_s1, %s1391_s28  ;;  %p1395_p9 = scmp.lt.u32.totalorder %s1391_s28, %s1513_s1 }
  0x16   :  { %p1397_p10 = pnand %p1395_p9, %p1392_p8 }
  0x18   :  { %1400 = shalt.err (!%p1397_p10)
}
  0x19   :  { %s1401_s6 = scalar_lea.vmem %s1466_s15, 16384  ;;  %p1406_p12 = scmp.lt.s32.totalorder %s1466_s15, %s1466_s15 }
  0x1a   :  { %p1402_p11 = scmp.ne.s32.totalorder %s1466_s15, %s1401_s6  ;;  %p1407_p13 = scmp.lt.s32.totalorder %s1401_s6, %s1401_s6 }
  0x1c   :  { %p1408_p0 = por %p1407_p13, %p1406_p12 }
  0x1e   :  { %p1409_p1 = pnand %p1408_p0, %p1402_p11 }
  0x20   :  { %1412 = shalt.err (!%p1409_p1)
}
  0x21   :  { %s1443_s0 = smov 128   ;;  %s1444_s7 = smov 8  }
  0x22   :  { %32 = dma.hbm_to_vmem [thread:$0]  %s1513_s1, 16384, %s1466_s15, [#allocation6], %s1443_s0, %s1443_s0, %s1444_s7  }
  0x23   :  { %1435 = dma.done.wait [#allocation3], 1024  }
  0x24   :  { %1436 = vsyncadd [#allocation3], 4294966272 }
  0x25   :  { %1437 = dma.done.wait [#allocation6], 16384  }
  0x26   :  { %1438 = vsyncadd [#allocation6], 4294950912  ;;  %v1177_v0 = vld [vmem:[#allocation5 + $0x4] ss:$8 sps:$4 sm:$0xff]   ;;  %v1181_v2 = vld [vmem:[#allocation5] ss:$8 sps:$4 sm:$0xff]  }
  0x27   :  { %v1179_v1 = vld [vmem:[#allocation5 + $0x104] ss:$8 sps:$4 sm:$0xff]   ;;  %825 = vmatprep.subr.bf16.mxu0 %v1177_v0  ;;  %v1182_v3 = vld [vmem:[#allocation5 + $0x100] ss:$8 sps:$4 sm:$0xff]   ;;  %v1183_v4 = vld [vmem:[#allocation5 + $0x14] ss:$8 sps:$4 sm:$0xff]  }
  0x28   :  { %866 = vmatprep.subr.bf16.mxu1 %v1179_v1  ;;  %826 = vmatpush1.bf16.msra.mxu0 %v1181_v2  ;;  %v1185_v5 = vld [vmem:[#allocation5 + $0x114] ss:$8 sps:$4 sm:$0xff]   ;;  %v1187_v6 = vld [vmem:[#allocation5 + $0x10] ss:$8 sps:$4 sm:$0xff]   ;;  %v1189_v8 = vld [vmem:[#allocation5 + $0x24] ss:$8 sps:$4 sm:$0xff]  }
  0x29   :  { %867 = vmatpush1.bf16.msra.mxu1 %v1182_v3  ;;  %827 = vmatprep.subr.bf16.mxu0 %v1183_v4  ;;  %v1188_v7 = vld [vmem:[#allocation5 + $0x110] ss:$8 sps:$4 sm:$0xff]   ;;  %v1191_v9 = vld [vmem:[#allocation5 + $0x124] ss:$8 sps:$4 sm:$0xff]   ;;  %v1193_v10 = vld [vmem:[#allocation5 + $0x20] ss:$8 sps:$4 sm:$0xff]  }
  0x2a   :  { %868 = vmatprep.subr.bf16.mxu1 %v1185_v5  ;;  %v1194_v11 = vld [vmem:[#allocation5 + $0x120] ss:$8 sps:$4 sm:$0xff]   ;;  %v1195_v12 = vld [vmem:[#allocation5 + $0x34] ss:$8 sps:$4 sm:$0xff]   ;;  %v1199_v14 = vld [vmem:[#allocation5 + $0x30] ss:$8 sps:$4 sm:$0xff]  }
  0x2b   :  { %v1197_v13 = vld [vmem:[#allocation5 + $0x134] ss:$8 sps:$4 sm:$0xff]   ;;  %v1200_v15 = vld [vmem:[#allocation5 + $0x130] ss:$8 sps:$4 sm:$0xff]   ;;  %v1201_v16 = vld [vmem:[#allocation5 + $0x44] ss:$8 sps:$4 sm:$0xff]  }
  0x2c   :  { %828 = vmatpush1.bf16.msra.mxu0 %v1187_v6  ;;  %v1203_v17 = vld [vmem:[#allocation5 + $0x144] ss:$8 sps:$4 sm:$0xff]   ;;  %v1205_v18 = vld [vmem:[#allocation5 + $0x40] ss:$8 sps:$4 sm:$0xff]   ;;  %v1207_v20 = vld [vmem:[#allocation5 + $0x54] ss:$8 sps:$4 sm:$0xff]  }
  0x2d   :  { %869 = vmatpush1.bf16.msra.mxu1 %v1188_v7  ;;  %829 = vmatprep.subr.bf16.mxu0 %v1189_v8  ;;  %v1206_v19 = vld [vmem:[#allocation5 + $0x140] ss:$8 sps:$4 sm:$0xff]   ;;  %v1209_v21 = vld [vmem:[#allocation5 + $0x154] ss:$8 sps:$4 sm:$0xff]   ;;  %v1211_v22 = vld [vmem:[#allocation5 + $0x50] ss:$8 sps:$4 sm:$0xff]  }
  0x2e   :  { %870 = vmatprep.subr.bf16.mxu1 %v1191_v9  ;;  %v1212_v23 = vld [vmem:[#allocation5 + $0x150] ss:$8 sps:$4 sm:$0xff]   ;;  %v1213_v24 = vld [vmem:[#allocation5 + $0x64] ss:$8 sps:$4 sm:$0xff]   ;;  %v1217_v26 = vld [vmem:[#allocation5 + $0x60] ss:$8 sps:$4 sm:$0xff]  }
  0x2f   :  { %v1215_v25 = vld [vmem:[#allocation5 + $0x164] ss:$8 sps:$4 sm:$0xff]   ;;  %v1218_v27 = vld [vmem:[#allocation5 + $0x160] ss:$8 sps:$4 sm:$0xff]   ;;  %v1219_v28 = vld [vmem:[#allocation5 + $0x74] ss:$8 sps:$4 sm:$0xff]  }
  0x30   :  { %830 = vmatpush1.bf16.msra.mxu0 %v1193_v10  ;;  %v1221_v29 = vld [vmem:[#allocation5 + $0x174] ss:$8 sps:$4 sm:$0xff]   ;;  %v1223_v30 = vld [vmem:[#allocation5 + $0x70] ss:$8 sps:$4 sm:$0xff]   ;;  %v1225_v32 = vld [vmem:[#allocation5 + $0x84] ss:$8 sps:$4 sm:$0xff]  }
  0x31   :  { %871 = vmatpush1.bf16.msra.mxu1 %v1194_v11  ;;  %831 = vmatprep.subr.bf16.mxu0 %v1195_v12  ;;  %v1224_v31 = vld [vmem:[#allocation5 + $0x170] ss:$8 sps:$4 sm:$0xff]   ;;  %v1227_v33 = vld [vmem:[#allocation5 + $0x184] ss:$8 sps:$4 sm:$0xff]   ;;  %v1229_v34 = vld [vmem:[#allocation5 + $0x80] ss:$8 sps:$4 sm:$0xff]  }
  0x32   :  { %872 = vmatprep.subr.bf16.mxu1 %v1197_v13  ;;  %v1230_v35 = vld [vmem:[#allocation5 + $0x180] ss:$8 sps:$4 sm:$0xff]   ;;  %v1231_v36 = vld [vmem:[#allocation5 + $0x94] ss:$8 sps:$4 sm:$0xff]   ;;  %v1235_v38 = vld [vmem:[#allocation5 + $0x90] ss:$8 sps:$4 sm:$0xff]  }
  0x33   :  { %v1233_v37 = vld [vmem:[#allocation5 + $0x194] ss:$8 sps:$4 sm:$0xff]   ;;  %v1236_v39 = vld [vmem:[#allocation5 + $0x190] ss:$8 sps:$4 sm:$0xff]   ;;  %v1237_v40 = vld [vmem:[#allocation5 + $0xa4] ss:$8 sps:$4 sm:$0xff]  }
  0x34   :  { %832 = vmatpush1.bf16.msra.mxu0 %v1199_v14  ;;  %v1239_v41 = vld [vmem:[#allocation5 + $0x1a4] ss:$8 sps:$4 sm:$0xff]   ;;  %v1241_v42 = vld [vmem:[#allocation5 + $0xa0] ss:$8 sps:$4 sm:$0xff]   ;;  %v1243_v44 = vld [vmem:[#allocation5 + $0xb4] ss:$8 sps:$4 sm:$0xff]  }
  0x35   :  { %873 = vmatpush1.bf16.msra.mxu1 %v1200_v15  ;;  %833 = vmatprep.subr.bf16.mxu0 %v1201_v16  ;;  %v1242_v43 = vld [vmem:[#allocation5 + $0x1a0] ss:$8 sps:$4 sm:$0xff]   ;;  %v1245_v45 = vld [vmem:[#allocation5 + $0x1b4] ss:$8 sps:$4 sm:$0xff]   ;;  %v1247_v47 = vld [vmem:[#allocation5 + $0xb0] ss:$8 sps:$4 sm:$0xff]  }
  0x36   :  { %874 = vmatprep.subr.bf16.mxu1 %v1203_v17  ;;  %v42_v46 = vld [vmem:[#allocation2 + $0x8] sm:$0xff]  ;;  %v1248_v48 = vld [vmem:[#allocation5 + $0x1b0] ss:$8 sps:$4 sm:$0xff]   ;;  %v1255_v56 = vld [vmem:[#allocation5 + $0xd4] ss:$8 sps:$4 sm:$0xff]   ;;  %s1445_s11 = smov [#allocation7]  }
  0x37   :  { %v50_v49 = vpack.c.bf16 %v42_v46, %v42_v46  ;;  %v44_v50 = vld [vmem:[#allocation2 + $0x18] sm:$0xff]  ;;  %v1249_v51 = vld [vmem:[#allocation5 + $0xc4] ss:$8 sps:$4 sm:$0xff]   ;;  %v1253_v54 = vld [vmem:[#allocation5 + $0xc0] ss:$8 sps:$4 sm:$0xff]   ;;  %s1034_s12 = sshll.u32 %s1445_s11, 4  ;;  %s1035_s12 = int_to_ptr.vmem [resolvable:$true] %s1034_s12 }
  0x38   :  { %834 = vmatpush1.bf16.msra.mxu0 %v1205_v18  ;;  %v52_v52 = vpack.c.bf16 %v44_v50, %v44_v50  ;;  %v1251_v53 = vld [vmem:[#allocation5 + $0x1c4] ss:$8 sps:$4 sm:$0xff]   ;;  %v1254_v55 = vld [vmem:[#allocation5 + $0x1c0] ss:$8 sps:$4 sm:$0xff]   ;;  %v1257_v57 = vld [vmem:[#allocation5 + $0x1d4] ss:$8 sps:$4 sm:$0xff]   ;;  %p1418_p3 = scmp.lt.s32.totalorder %s1035_s12, %s1035_s12 }
  0x39   :  { %875 = vmatpush1.bf16.msra.mxu1 %v1206_v19  ;;  %835 = vmatprep.subr.bf16.mxu0 %v1207_v20  ;;  %v1259_v58 = vld [vmem:[#allocation5 + $0xd0] ss:$8 sps:$4 sm:$0xff]   ;;  %v1261_v60 = vld [vmem:[#allocation5 + $0xe4] ss:$8 sps:$4 sm:$0xff]   ;;  %v1265_v62 = vld [vmem:[#allocation5 + $0xe0] ss:$8 sps:$4 sm:$0xff]  }
  0x3a   :  { %876 = vmatprep.subr.bf16.mxu1 %v1209_v21  ;;  %857 = vmatprep.mubr.bf16.mxu0 %v50_v49  ;;  %v1260_v59 = vld [vmem:[#allocation5 + $0x1d0] ss:$8 sps:$4 sm:$0xff]   ;;  %v1263_v61 = vld [vmem:[#allocation5 + $0x1e4] ss:$8 sps:$4 sm:$0xff]   ;;  %v1266_v63 = vld [vmem:[#allocation5 + $0x1e0] ss:$8 sps:$4 sm:$0xff]  }
  0x3b   :  { %898 = vmatprep.mubr.bf16.mxu1 %v52_v52  ;;  %v1267_v0 = vld [vmem:[#allocation5 + $0xf4] ss:$8 sps:$4 sm:$0xff]   ;;  %v1271_v2 = vld [vmem:[#allocation5 + $0xf0] ss:$8 sps:$4 sm:$0xff]   ;;  %v41_v4 = vld [vmem:[#allocation2] sm:$0xff] }
  0x3c   :  { %836 = vmatpush1.bf16.msra.mxu0 %v1211_v22  ;;  %v1269_v1 = vld [vmem:[#allocation5 + $0x1f4] ss:$8 sps:$4 sm:$0xff]   ;;  %v1272_v3 = vld [vmem:[#allocation5 + $0x1f0] ss:$8 sps:$4 sm:$0xff]   ;;  %v1275_v6 = vld [vmem:[#allocation5 + $0x204] ss:$8 sps:$4 sm:$0xff]   ;;  %v49_v8 = vpack.c.bf16 %v41_v4, %v41_v4 }
  0x3d   :  { %877 = vmatpush1.bf16.msra.mxu1 %v1212_v23  ;;  %837 = vmatprep.subr.bf16.mxu0 %v1213_v24  ;;  %v43_v5 = vld [vmem:[#allocation2 + $0x10] sm:$0xff]  ;;  %v1278_v7 = vld [vmem:[#allocation5 + $0x304] ss:$8 sps:$4 sm:$0xff]   ;;  %v1273_v10 = vld [vmem:[#allocation5 + $0x200] ss:$8 sps:$4 sm:$0xff]  }
  0x3e   :  { %878 = vmatprep.subr.bf16.mxu1 %v1215_v25  ;;  %v51_v9 = vpack.c.bf16 %v43_v5, %v43_v5  ;;  %v1276_v11 = vld [vmem:[#allocation5 + $0x300] ss:$8 sps:$4 sm:$0xff]   ;;  %v1281_v12 = vld [vmem:[#allocation5 + $0x214] ss:$8 sps:$4 sm:$0xff]   ;;  %v1279_v14 = vld [vmem:[#allocation5 + $0x210] ss:$8 sps:$4 sm:$0xff]  }
  0x3f   :  { %v1284_v13 = vld [vmem:[#allocation5 + $0x314] ss:$8 sps:$4 sm:$0xff]   ;;  %v1282_v15 = vld [vmem:[#allocation5 + $0x310] ss:$8 sps:$4 sm:$0xff]   ;;  %v1287_v16 = vld [vmem:[#allocation5 + $0x224] ss:$8 sps:$4 sm:$0xff]  }
  0x40   :  { %838 = vmatpush1.bf16.msra.mxu0 %v1217_v26  ;;  %v1290_v17 = vld [vmem:[#allocation5 + $0x324] ss:$8 sps:$4 sm:$0xff]   ;;  %v1285_v18 = vld [vmem:[#allocation5 + $0x220] ss:$8 sps:$4 sm:$0xff]   ;;  %v1293_v20 = vld [vmem:[#allocation5 + $0x234] ss:$8 sps:$4 sm:$0xff]  }
  0x41   :  { %879 = vmatpush1.bf16.msra.mxu1 %v1218_v27  ;;  %839 = vmatprep.subr.bf16.mxu0 %v1219_v28  ;;  %v1288_v19 = vld [vmem:[#allocation5 + $0x320] ss:$8 sps:$4 sm:$0xff]   ;;  %v1296_v21 = vld [vmem:[#allocation5 + $0x334] ss:$8 sps:$4 sm:$0xff]   ;;  %v1291_v22 = vld [vmem:[#allocation5 + $0x230] ss:$8 sps:$4 sm:$0xff]  }
  0x42   :  { %880 = vmatprep.subr.bf16.mxu1 %v1221_v29  ;;  %v1294_v23 = vld [vmem:[#allocation5 + $0x330] ss:$8 sps:$4 sm:$0xff]   ;;  %v1299_v24 = vld [vmem:[#allocation5 + $0x244] ss:$8 sps:$4 sm:$0xff]   ;;  %v1297_v26 = vld [vmem:[#allocation5 + $0x240] ss:$8 sps:$4 sm:$0xff]  }
  0x43   :  { %v1302_v25 = vld [vmem:[#allocation5 + $0x344] ss:$8 sps:$4 sm:$0xff]   ;;  %v1300_v27 = vld [vmem:[#allocation5 + $0x340] ss:$8 sps:$4 sm:$0xff]   ;;  %v1305_v28 = vld [vmem:[#allocation5 + $0x254] ss:$8 sps:$4 sm:$0xff]  }
  0x44   :  { %840 = vmatpush1.bf16.msra.mxu0 %v1223_v30  ;;  %v1308_v29 = vld [vmem:[#allocation5 + $0x354] ss:$8 sps:$4 sm:$0xff]   ;;  %v1303_v30 = vld [vmem:[#allocation5 + $0x250] ss:$8 sps:$4 sm:$0xff]   ;;  %v1321_v46 = vld [vmem:[#allocation5 + $0x280] ss:$8 sps:$4 sm:$0xff]  }
  0x45   :  { %881 = vmatpush1.bf16.msra.mxu1 %v1224_v31  ;;  %841 = vmatprep.subr.bf16.mxu0 %v1225_v32  ;;  %v1306_v31 = vld [vmem:[#allocation5 + $0x350] ss:$8 sps:$4 sm:$0xff]   ;;  %v1311_v32 = vld [vmem:[#allocation5 + $0x264] ss:$8 sps:$4 sm:$0xff]   ;;  %v1332_v49 = vld [vmem:[#allocation5 + $0x394] ss:$8 sps:$4 sm:$0xff]  }
  0x46   :  { %882 = vmatprep.subr.bf16.mxu1 %v1227_v33  ;;  %v1314_v33 = vld [vmem:[#allocation5 + $0x364] ss:$8 sps:$4 sm:$0xff]   ;;  %v1327_v50 = vld [vmem:[#allocation5 + $0x290] ss:$8 sps:$4 sm:$0xff]  }
  0x47   :  { %v1335_v52 = vld [vmem:[#allocation5 + $0x2a4] ss:$8 sps:$4 sm:$0xff]  }
  0x48   :  { %842 = vmatpush1.bf16.msra.mxu0 %v1229_v34  ;;  %v46_v34 = vld [vmem:[#allocation2 + $0x28] sm:$0xff] }
  0x49   :  { %883 = vmatpush1.bf16.msra.mxu1 %v1230_v35  ;;  %843 = vmatprep.subr.bf16.mxu0 %v1231_v36  ;;  %v54_v35 = vpack.c.bf16 %v46_v34, %v46_v34  ;;  %v48_v36 = vld [vmem:[#allocation2 + $0x38] sm:$0xff]  ;;  %v1359_v4 = vld [vmem:[#allocation5 + $0x2e4] ss:$8 sps:$4 sm:$0xff]  }
  0x4a   :  { %884 = vmatprep.subr.bf16.mxu1 %v1233_v37  ;;  %v1309_v37 = vld [vmem:[#allocation5 + $0x260] ss:$8 sps:$4 sm:$0xff]   ;;  %v1362_v5 = vld [vmem:[#allocation5 + $0x3e4] ss:$8 sps:$4 sm:$0xff]  }
  0x4c   :  { %844 = vmatpush1.bf16.msra.mxu0 %v1235_v38  ;;  %v1312_v38 = vld [vmem:[#allocation5 + $0x360] ss:$8 sps:$4 sm:$0xff]  }
  0x4d   :  { %885 = vmatpush1.bf16.msra.mxu1 %v1236_v39  ;;  %845 = vmatprep.subr.bf16.mxu0 %v1237_v40  ;;  %v56_v39 = vpack.c.bf16 %v48_v36, %v48_v36  ;;  %v1317_v40 = vld [vmem:[#allocation5 + $0x274] ss:$8 sps:$4 sm:$0xff]  }
  0x4e   :  { %886 = vmatprep.subr.bf16.mxu1 %v1239_v41  ;;  %v1320_v41 = vld [vmem:[#allocation5 + $0x374] ss:$8 sps:$4 sm:$0xff]  }
  0x50   :  { %846 = vmatpush1.bf16.msra.mxu0 %v1241_v42  ;;  %v1315_v42 = vld [vmem:[#allocation5 + $0x270] ss:$8 sps:$4 sm:$0xff]  }
  0x51   :  { %887 = vmatpush1.bf16.msra.mxu1 %v1242_v43  ;;  %847 = vmatprep.subr.bf16.mxu0 %v1243_v44  ;;  %v1318_v43 = vld [vmem:[#allocation5 + $0x370] ss:$8 sps:$4 sm:$0xff]   ;;  %v1323_v44 = vld [vmem:[#allocation5 + $0x284] ss:$8 sps:$4 sm:$0xff]  }
  0x52   :  { %888 = vmatprep.subr.bf16.mxu1 %v1245_v45  ;;  %v1326_v45 = vld [vmem:[#allocation5 + $0x384] ss:$8 sps:$4 sm:$0xff]  }
  0x54   :  { %848 = vmatpush1.bf16.msra.mxu0 %v1247_v47  ;;  %v1324_v47 = vld [vmem:[#allocation5 + $0x380] ss:$8 sps:$4 sm:$0xff]  }
  0x55   :  { %889 = vmatpush1.bf16.msra.mxu1 %v1248_v48  ;;  %849 = vmatprep.subr.bf16.mxu0 %v1249_v51  ;;  %v1329_v48 = vld [vmem:[#allocation5 + $0x294] ss:$8 sps:$4 sm:$0xff]   ;;  %v1330_v51 = vld [vmem:[#allocation5 + $0x390] ss:$8 sps:$4 sm:$0xff]  }
  0x56   :  { %890 = vmatprep.subr.bf16.mxu1 %v1251_v53  ;;  %v1338_v53 = vld [vmem:[#allocation5 + $0x3a4] ss:$8 sps:$4 sm:$0xff]  }
  0x58   :  { %850 = vmatpush1.bf16.msra.mxu0 %v1253_v54  ;;  %v1333_v54 = vld [vmem:[#allocation5 + $0x2a0] ss:$8 sps:$4 sm:$0xff]  }
  0x59   :  { %891 = vmatpush1.bf16.msra.mxu1 %v1254_v55  ;;  %851 = vmatprep.subr.bf16.mxu0 %v1255_v56  ;;  %v1336_v55 = vld [vmem:[#allocation5 + $0x3a0] ss:$8 sps:$4 sm:$0xff]   ;;  %v1341_v56 = vld [vmem:[#allocation5 + $0x2b4] ss:$8 sps:$4 sm:$0xff]  }
  0x5a   :  { %892 = vmatprep.subr.bf16.mxu1 %v1257_v57  ;;  %v1344_v57 = vld [vmem:[#allocation5 + $0x3b4] ss:$8 sps:$4 sm:$0xff]  }
  0x5c   :  { %852 = vmatpush1.bf16.msra.mxu0 %v1259_v58  ;;  %v1339_v58 = vld [vmem:[#allocation5 + $0x2b0] ss:$8 sps:$4 sm:$0xff]  }
  0x5d   :  { %893 = vmatpush1.bf16.msra.mxu1 %v1260_v59  ;;  %853 = vmatprep.subr.bf16.mxu0 %v1261_v60  ;;  %v1342_v59 = vld [vmem:[#allocation5 + $0x3b0] ss:$8 sps:$4 sm:$0xff]   ;;  %v1347_v60 = vld [vmem:[#allocation5 + $0x2c4] ss:$8 sps:$4 sm:$0xff]  }
  0x5e   :  { %894 = vmatprep.subr.bf16.mxu1 %v1263_v61  ;;  %v1350_v61 = vld [vmem:[#allocation5 + $0x3c4] ss:$8 sps:$4 sm:$0xff]  }
  0x60   :  { %854 = vmatpush1.bf16.msra.mxu0 %v1265_v62  ;;  %v1345_v62 = vld [vmem:[#allocation5 + $0x2c0] ss:$8 sps:$4 sm:$0xff]  }
  0x61   :  { %895 = vmatpush1.bf16.msra.mxu1 %v1266_v63  ;;  %855 = vmatprep.subr.bf16.mxu0 %v1267_v0  ;;  %v1348_v63 = vld [vmem:[#allocation5 + $0x3c0] ss:$8 sps:$4 sm:$0xff]   ;;  %v1353_v0 = vld [vmem:[#allocation5 + $0x2d4] ss:$8 sps:$4 sm:$0xff]  }
  0x62   :  { %896 = vmatprep.subr.bf16.mxu1 %v1269_v1  ;;  %v1356_v1 = vld [vmem:[#allocation5 + $0x3d4] ss:$8 sps:$4 sm:$0xff]  }
  0x64   :  { %856 = vmatpush1.bf16.msra.mxu0 %v1271_v2  ;;  %v1351_v2 = vld [vmem:[#allocation5 + $0x2d0] ss:$8 sps:$4 sm:$0xff]  }
  0x65   :  { %897 = vmatpush1.bf16.msra.mxu1 %v1272_v3  ;;  %907 = vmatprep.subr.bf16.mxu0 %v1275_v6  ;;  %v1354_v3 = vld [vmem:[#allocation5 + $0x3d0] ss:$8 sps:$4 sm:$0xff]   ;;  %v1357_v6 = vld [vmem:[#allocation5 + $0x2e0] ss:$8 sps:$4 sm:$0xff]  }
  0x66   :  { %948 = vmatprep.subr.bf16.mxu1 %v1278_v7  ;;  %v1360_v7 = vld [vmem:[#allocation5 + $0x3e0] ss:$8 sps:$4 sm:$0xff]  }
  0x67   :  { %858 = vmatmul.mubr.bf16.vlgmr.msra.gmra.mrb[0].mxu0 %v49_v8  ;;  %v1365_v8 = vld [vmem:[#allocation5 + $0x2f4] ss:$8 sps:$4 sm:$0xff]  }
  0x68   :  { %899 = vmatmul.mubr.bf16.vlgmr.msra.gmra.mrb[0].mxu1 %v51_v9  ;;  %908 = vmatpush1.bf16.msra.mxu0 %v1273_v10  ;;  %v1368_v9 = vld [vmem:[#allocation5 + $0x3f4] ss:$8 sps:$4 sm:$0xff]   ;;  %v1363_v10 = vld [vmem:[#allocation5 + $0x2f0] ss:$8 sps:$4 sm:$0xff]  }
  0x69   :  { %949 = vmatpush1.bf16.msra.mxu1 %v1276_v11  ;;  %909 = vmatprep.subr.bf16.mxu0 %v1281_v12  ;;  %v1366_v11 = vld [vmem:[#allocation5 + $0x3f0] ss:$8 sps:$4 sm:$0xff]   ;;  %v45_v12 = vld [vmem:[#allocation2 + $0x20] sm:$0xff] }
  0x6a   :  { %950 = vmatprep.subr.bf16.mxu1 %v1284_v13  ;;  %939 = vmatprep.mubr.bf16.mxu0 %v54_v35  ;;  %v47_v13 = vld [vmem:[#allocation2 + $0x30] sm:$0xff] }
  0x6b   :  { %980 = vmatprep.mubr.bf16.mxu1 %v56_v39 }
  0x6c   :  { %910 = vmatpush1.bf16.msra.mxu0 %v1279_v14  ;;  %v53_v14 = vpack.c.bf16 %v45_v12, %v45_v12 }
  0x6d   :  { %951 = vmatpush1.bf16.msra.mxu1 %v1282_v15  ;;  %911 = vmatprep.subr.bf16.mxu0 %v1287_v16  ;;  %v55_v15 = vpack.c.bf16 %v47_v13, %v47_v13 }
  0x6e   :  { %952 = vmatprep.subr.bf16.mxu1 %v1290_v17 }
  0x70   :  { %912 = vmatpush1.bf16.msra.mxu0 %v1285_v18 }
  0x71   :  { %953 = vmatpush1.bf16.msra.mxu1 %v1288_v19  ;;  %913 = vmatprep.subr.bf16.mxu0 %v1293_v20 }
  0x72   :  { %954 = vmatprep.subr.bf16.mxu1 %v1296_v21 }
  0x74   :  { %914 = vmatpush1.bf16.msra.mxu0 %v1291_v22 }
  0x75   :  { %955 = vmatpush1.bf16.msra.mxu1 %v1294_v23  ;;  %915 = vmatprep.subr.bf16.mxu0 %v1299_v24 }
  0x76   :  { %956 = vmatprep.subr.bf16.mxu1 %v1302_v25 }
  0x78   :  { %916 = vmatpush1.bf16.msra.mxu0 %v1297_v26  ;;  %v1012_v26 = vlaneseq }
  0x79   :  { %957 = vmatpush1.bf16.msra.mxu1 %v1300_v27  ;;  %917 = vmatprep.subr.bf16.mxu0 %v1305_v28 }
  0x7a   :  { %958 = vmatprep.subr.bf16.mxu1 %v1308_v29  ;;  %v1013_v27 = vshrl.u32 %v1012_v26, 7  ;;  %v1010_v29 = vld [vmem:[%s1514_s2] sm:$0x3]  ;;  %s1413_s2 = scalar_lea.vmem %s1035_s12, 256 }
  0x7b   :  { %p1414_p2 = scmp.ne.s32.totalorder %s1035_s12, %s1413_s2  ;;  %p1419_p4 = scmp.lt.s32.totalorder %s1413_s2, %s1413_s2 }
  0x7c   :  { %918 = vmatpush1.bf16.msra.mxu0 %v1303_v30  ;;  %v1014_v28 = vsub.s32 0, %v1013_v27  ;;  %v1018_v30 = vsub.s32 1, %v1013_v27 }
  0x7d   :  { %959 = vmatpush1.bf16.msra.mxu1 %v1306_v31  ;;  %919 = vmatprep.subr.bf16.mxu0 %v1311_v32  ;;  %p1420_p5 = por %p1419_p4, %p1418_p3 }
  0x7e   :  { %960 = vmatprep.subr.bf16.mxu1 %v1314_v33  ;;  %v1015_v36 = vrot.slane %v1010_v29, %v1014_v28 }
  0x7f   :  { %p1421_p6 = pnand %p1420_p5, %p1414_p2 }
  0x80   :  { %920 = vmatpush1.bf16.msra.mxu0 %v1309_v37 }
  0x81   :  { %961 = vmatpush1.bf16.msra.mxu1 %v1312_v38  ;;  %921 = vmatprep.subr.bf16.mxu0 %v1317_v40  ;;  %v1019_v40 = vrot.slane %v1010_v29, %v1018_v30 }
  0x82   :  { %962 = vmatprep.subr.bf16.mxu1 %v1320_v41 }
  0x84   :  { %922 = vmatpush1.bf16.msra.mxu0 %v1315_v42 }
  0x85   :  { %963 = vmatpush1.bf16.msra.mxu1 %v1318_v43  ;;  %923 = vmatprep.subr.bf16.mxu0 %v1323_v44 }
  0x86   :  { %964 = vmatprep.subr.bf16.mxu1 %v1326_v45 }
  0x88   :  { %924 = vmatpush1.bf16.msra.mxu0 %v1321_v46 }
  0x89   :  { %965 = vmatpush1.bf16.msra.mxu1 %v1324_v47  ;;  %925 = vmatprep.subr.bf16.mxu0 %v1329_v48 }
  0x8a   :  { %966 = vmatprep.subr.bf16.mxu1 %v1332_v49 }
  0x8c   :  { %926 = vmatpush1.bf16.msra.mxu0 %v1327_v50 }
  0x8d   :  { %967 = vmatpush1.bf16.msra.mxu1 %v1330_v51  ;;  %927 = vmatprep.subr.bf16.mxu0 %v1335_v52 }
  0x8e   :  { %968 = vmatprep.subr.bf16.mxu1 %v1338_v53 }
  0x90   :  { %928 = vmatpush1.bf16.msra.mxu0 %v1333_v54 }
  0x91   :  { %969 = vmatpush1.bf16.msra.mxu1 %v1336_v55  ;;  %929 = vmatprep.subr.bf16.mxu0 %v1341_v56 }
  0x92   :  { %970 = vmatprep.subr.bf16.mxu1 %v1344_v57 }
  0x94   :  { %930 = vmatpush1.bf16.msra.mxu0 %v1339_v58 }
  0x95   :  { %971 = vmatpush1.bf16.msra.mxu1 %v1342_v59  ;;  %931 = vmatprep.subr.bf16.mxu0 %v1347_v60 }
  0x96   :  { %972 = vmatprep.subr.bf16.mxu1 %v1350_v61 }
  0x98   :  { %932 = vmatpush1.bf16.msra.mxu0 %v1345_v62 }
  0x99   :  { %973 = vmatpush1.bf16.msra.mxu1 %v1348_v63  ;;  %933 = vmatprep.subr.bf16.mxu0 %v1353_v0 }
  0x9a   :  { %974 = vmatprep.subr.bf16.mxu1 %v1356_v1 }
  0x9c   :  { %934 = vmatpush1.bf16.msra.mxu0 %v1351_v2 }
  0x9d   :  { %975 = vmatpush1.bf16.msra.mxu1 %v1354_v3  ;;  %935 = vmatprep.subr.bf16.mxu0 %v1359_v4 }
  0x9e   :  { %976 = vmatprep.subr.bf16.mxu1 %v1362_v5 }
  0xa0   :  { %936 = vmatpush1.bf16.msra.mxu0 %v1357_v6 }
  0xa1   :  { %977 = vmatpush1.bf16.msra.mxu1 %v1360_v7  ;;  %937 = vmatprep.subr.bf16.mxu0 %v1365_v8 }
  0xa2   :  { %978 = vmatprep.subr.bf16.mxu1 %v1368_v9 }
  0xa4   :  { %938 = vmatpush1.bf16.msra.mxu0 %v1363_v10 }
  0xa5   :  { %979 = vmatpush1.bf16.msra.mxu1 %v1366_v11 }
  0xa7   :  { %940 = vmatmul.mubr.bf16.vlgmr.msra.gmra.mrb[4].mxu0 %v53_v14 }
  0xa8   :  { %981 = vmatmul.mubr.bf16.vlgmr.msra.gmra.mrb[4].mxu1 %v55_v15 }
 0x13a   :  { %v859_v16 = vpop.f32.mrb[0].mxu0 }
 0x13b   :  { %v900_v17 = vpop.f32.mrb[0].mxu1  ;;  %v861_v19 = vpop.f32.mrb[1].mxu0 }
 0x13c   :  { %v901_v18 = vadd.f32 %v900_v17, %v859_v16  ;;  %v902_v20 = vpop.f32.mrb[1].mxu1  ;;  %v863_v22 = vpop.f32.mrb[2].mxu0 }
 0x13d   :  { %v903_v21 = vadd.f32 %v902_v20, %v861_v19  ;;  %v904_v23 = vpop.f32.mrb[2].mxu1  ;;  %v864_v24 = vpop.f32.mrb[3].mxu0 }
 0x13e   :  { %v905_v25 = vpop.f32.mrb[3].mxu1 }
 0x17a   :  { %v941_v31 = vpop.f32.mrb[4].mxu0 }
 0x17b   :  { %v982_v32 = vpop.f32.mrb[4].mxu1  ;;  %v942_v33 = vadd.f32 %v941_v31, %v901_v18  ;;  %v943_v34 = vpop.f32.mrb[5].mxu0 }
 0x17c   :  { %v984_v35 = vpop.f32.mrb[5].mxu1  ;;  %v944_v37 = vadd.f32 %v943_v34, %v903_v21  ;;  %v945_v38 = vpop.f32.mrb[6].mxu0 }
 0x17d   :  { %v986_v39 = vpop.f32.mrb[6].mxu1  ;;  %v983_v41 = vadd.f32 %v982_v32, %v942_v33  ;;  %v946_v42 = vpop.f32.mrb[7].mxu0 }
 0x17e   :  { %v987_v43 = vpop.f32.mrb[7].mxu1  ;;  %v985_v44 = vadd.f32 %v984_v35, %v944_v37 }
 0x17f   :  { %v1022_v45 = vadd.f32 %v1015_v36, %v983_v41 }
 0x180   :  { %v1023_v46 = vadd.f32 %v1019_v40, %v985_v44 }
 0x181   :  { %v1024_v47 = vmax.f32 %v1022_v45, 0.0 }
 0x182   :  { %v1025_v48 = vmax.f32 %v1023_v46, 0.0 }
 0x183   :  { %1026 = vst [vmem:[#allocation7] sm:$0xff] %v1024_v47 }
 0x184   :  { %1027 = vst [vmem:[#allocation7 + $0x8] sm:$0xff] %v1025_v48 }
 0x185   :  { %1424 = shalt.err (!%p1421_p6)
}
 0x186   :  { %s1425_s15 = scalar_lea.hbm %s1515_s3, 256 }
 0x187   :  { %p1426_p7 = scmp.ne.s32.totalorder %s1515_s3, %s1425_s15  ;;  %p1429_p8 = scmp.lt.u32.totalorder %s1425_s15, %s1515_s3 }
 0x189   :  { %p1431_p9 = pnand %p1429_p8, %p1426_p7 }
 0x18b   :  { %1434 = shalt.err (!%p1431_p9)
}
 0x18c   :  { %1037 = dma.vmem_to_hbm [thread:$0]  %s1035_s12, 256, %s1515_s3, [#allocation4]  }
 0x18d   :  { %1439 = dma.done.wait [#allocation4], 256  }
 0x18e   :  { %1440 = vsyncadd [#allocation4], 4294967040 }
 0x18f   :  { %1041 = vsyncpa [#allocation3], 1 }
 0x190   :  { %1042 = vsyncpa [#allocation6], 1 }
 0x191   :  { %1043 = vsyncpa [#allocation4], 1 }

</bundles_post_ra>
